<compile_context>
chip_gen: v7x
topology: tpu7x:2x2x1
jax: 0.10.0
libtpu: 0.0.40
codegen_flags: <defaults>
</compile_context>

<pallas_src>
import jax
import jax.numpy as jnp
from jax.experimental import pallas as pl
from jax.experimental.pallas import tpu as pltpu

_LANE = 128


def _round_up(x, m):
    return ((x + m - 1) // m) * m


def _make_wmse_kernel(concentration_weight, sensor_weight, threshold):
    cw1 = float(concentration_weight) + 1.0
    sw = float(sensor_weight)
    th = float(threshold)

    def kernel(pred_ref, targ_ref, mask_ref, out_ref):
        j = pl.program_id(1)  # HW-tile axis (reduction into the output block)

        @pl.when(j == 0)
        def _():
            out_ref[...] = jnp.zeros_like(out_ref)

        p = pred_ref[...].astype(jnp.float32)   # (1, C, T)
        t = targ_ref[...].astype(jnp.float32)   # (1, C, T)
        m = mask_ref[...].astype(jnp.float32)   # (1, 1, T) -> broadcast over C

        diff = p - t
        sq_err = diff * diff                                   # mse, reduction='none'
        conc_w = jnp.where(t > th, jnp.float32(cw1), jnp.float32(1.0))
        sens_w = m * jnp.float32(sw) + 1.0
        out_ref[...] += sq_err * (conc_w * sens_w)             # VPU-only per step

    return kernel


def weighted_mse_loss(prediction, target, sensor_mask,
                      concentration_weight=3.0, sensor_weight=2.0, threshold=0.6):
    """prediction/target: (N, C, H, W); sensor_mask: (N, H, W). Returns scalar mean."""
    N, C, H, W = prediction.shape
    HW = H * W
    true_count = N * C * HW

    # Lane tile: multiple of 128, target 1024, capped so one (C, T) f32 block
    # stays well under the scoped-VMEM budget on every TPU generation
    # (3 streams x 2 pipeline buffers + resident output block).
    max_block_bytes = 2 * 1024 * 1024
    t_budget = max(_LANE, (max_block_bytes // (C * 4)) // _LANE * _LANE)
    lane_pad = _round_up(HW, _LANE)
    T = min(1024, t_budget, lane_pad)
    HW_pad = _round_up(HW, T)
    num_tiles = HW_pad // T

    pred2 = prediction.reshape(N, C, HW)
    targ2 = target.reshape(N, C, HW)
    mask2 = sensor_mask.reshape(N, 1, HW).astype(prediction.dtype)

    if HW_pad != HW:
        pad = HW_pad - HW
        # pred == targ == 0 and mask == 0 in the pad region => zero contribution.
        pred2 = jnp.pad(pred2, ((0, 0), (0, 0), (0, pad)))
        targ2 = jnp.pad(targ2, ((0, 0), (0, 0), (0, pad)))
        mask2 = jnp.pad(mask2, ((0, 0), (0, 0), (0, pad)))

    kernel = _make_wmse_kernel(concentration_weight, sensor_weight, threshold)

    partials = pl.pallas_call(
        kernel,
        out_shape=jax.ShapeDtypeStruct((N, C, T), jnp.float32),
        grid_spec=pltpu.PrefetchScalarGridSpec(
            num_scalar_prefetch=0,
            grid=(N, num_tiles),
            in_specs=[
                pl.BlockSpec((1, C, T), lambda i, j: (i, 0, j)),
                pl.BlockSpec((1, C, T), lambda i, j: (i, 0, j)),
                pl.BlockSpec((1, 1, T), lambda i, j: (i, 0, j)),
            ],
            # Same output block across the HW-tile axis => resident f32 accumulator.
            out_specs=pl.BlockSpec((1, C, T), lambda i, j: (i, 0, 0)),
        ),
        compiler_params=pltpu.CompilerParams(
            dimension_semantics=("parallel", "arbitrary"),
        ),
    )(pred2, targ2, mask2)

    # Tiny final reduction + mean in the wrapper.
    return jnp.sum(partials) / jnp.float32(true_count)


def weighted_mse_loss_ref(prediction, target, sensor_mask,
                          concentration_weight=3.0, sensor_weight=2.0, threshold=0.6):
    """Pure-JAX reference mirroring the PyTorch module."""
    mse = (prediction - target) ** 2
    high = (target > threshold).astype(jnp.float32)
    w = mse * (high * concentration_weight + 1.0)
    w = w * (sensor_mask.astype(jnp.float32) * sensor_weight + 1.0)[:, None, :, :]
    return jnp.mean(w)


if __name__ == "__main__":
    key = jax.random.PRNGKey(0)
    k1, k2, k3 = jax.random.split(key, 3)

    N, C, H, W = 2, 4, 16, 16
    prediction = jax.random.uniform(k1, (N, C, H, W), dtype=jnp.float32)
    target = jax.random.uniform(k2, (N, C, H, W), dtype=jnp.float32)
    sensor_mask = (jax.random.uniform(k3, (N, H, W)) > 0.8).astype(jnp.float32)

    out = jax.block_until_ready(weighted_mse_loss(prediction, target, sensor_mask))
    ref = jax.block_until_ready(
        weighted_mse_loss_ref(prediction, target, sensor_mask))

    assert jnp.allclose(out, ref, rtol=1e-5, atol=1e-6), (out, ref)
    print("KERNEL_OK")
</pallas_src>

<mosaic_0001>
module attributes {stable_mosaic.version = 11 : i64} {
  func.func @kernel(%arg0: i32, %arg1: i32, %arg2: memref<1x4x256xf32, #tpu.memory_space<vmem>>, %arg3: memref<1x4x256xf32, #tpu.memory_space<vmem>>, %arg4: memref<1x1x256xf32, #tpu.memory_space<vmem>>, %arg5: memref<1x4x256xf32, #tpu.memory_space<vmem>>) attributes {dimension_semantics = [#tpu.dimension_semantics<parallel>, #tpu.dimension_semantics<arbitrary>], iteration_bounds = array<i64: 2, 1>, scalar_prefetch = 0 : i64, scratch_operands = 0 : i64, tpu.core_type = #tpu.core_type<tc>, window_params = [{transform_indices = @transform_0, window_bounds = array<i64: 1, 4, 256>}, {transform_indices = @transform_1, window_bounds = array<i64: 1, 4, 256>}, {transform_indices = @transform_2, window_bounds = array<i64: 1, 1, 256>}, {transform_indices = @transform_3, window_bounds = array<i64: 1, 4, 256>}]} {
    %c0_i32 = arith.constant 0 : i32
    %0 = arith.cmpi eq, %arg1, %c0_i32 : i32
    %1 = arith.extui %0 : i1 to i32
    %c0_i32_0 = arith.constant 0 : i32
    %2 = arith.cmpi ne, %1, %c0_i32_0 : i32
    scf.if %2 {
      %cst_19 = arith.constant 0.000000e+00 : f32
      %23 = vector.broadcast %cst_19 : f32 to vector<1x4x256xf32>
      %c0_20 = arith.constant 0 : index
      %c0_21 = arith.constant 0 : index
      %c0_22 = arith.constant 0 : index
      %24 = vector.load %arg5[%c0_20, %c0_21, %c0_22] : memref<1x4x256xf32, #tpu.memory_space<vmem>>, vector<1x4x256xf32>
      tpu.vector_store %arg5[%c0_20, %c0_21, %c0_22], %23 {strides = array<i32>} : memref<1x4x256xf32, #tpu.memory_space<vmem>>, vector<1x4x256xf32>,
    } else {
    }
    %c0 = arith.constant 0 : index
    %c0_1 = arith.constant 0 : index
    %c0_2 = arith.constant 0 : index
    %3 = vector.load %arg2[%c0, %c0_1, %c0_2] : memref<1x4x256xf32, #tpu.memory_space<vmem>>, vector<1x4x256xf32>
    %c0_3 = arith.constant 0 : index
    %c0_4 = arith.constant 0 : index
    %c0_5 = arith.constant 0 : index
    %4 = vector.load %arg3[%c0_3, %c0_4, %c0_5] : memref<1x4x256xf32, #tpu.memory_space<vmem>>, vector<1x4x256xf32>
    %c0_6 = arith.constant 0 : index
    %c0_7 = arith.constant 0 : index
    %c0_8 = arith.constant 0 : index
    %5 = vector.load %arg4[%c0_6, %c0_7, %c0_8] : memref<1x1x256xf32, #tpu.memory_space<vmem>>, vector<1x1x256xf32>
    %6 = arith.subf %3, %4 : vector<1x4x256xf32>
    %7 = arith.mulf %6, %6 : vector<1x4x256xf32>
    %cst = arith.constant 6.000000e-01 : f32
    %8 = vector.broadcast %cst : f32 to vector<1x4x256xf32>
    %9 = arith.cmpf ogt, %4, %8 : vector<1x4x256xf32>
    %cst_9 = arith.constant 4.000000e+00 : f32
    %cst_10 = arith.constant 1.000000e+00 : f32
    %10 = vector.broadcast %cst_9 : f32 to vector<1x4x256xf32>
    %11 = vector.broadcast %cst_10 : f32 to vector<1x4x256xf32>
    %12 = arith.select %9, %10, %11 : vector<1x4x256xi1>, vector<1x4x256xf32>
    %cst_11 = arith.constant 2.000000e+00 : f32
    %13 = vector.broadcast %cst_11 : f32 to vector<1x1x256xf32>
    %14 = arith.mulf %5, %13 : vector<1x1x256xf32>
    %cst_12 = arith.constant 1.000000e+00 : f32
    %15 = vector.broadcast %cst_12 : f32 to vector<1x1x256xf32>
    %16 = arith.addf %14, %15 : vector<1x1x256xf32>
    %c0_13 = arith.constant 0 : index
    %c0_14 = arith.constant 0 : index
    %c0_15 = arith.constant 0 : index
    %17 = vector.load %arg5[%c0_13, %c0_14, %c0_15] : memref<1x4x256xf32, #tpu.memory_space<vmem>>, vector<1x4x256xf32>
    %18 = vector.broadcast %16 : vector<1x1x256xf32> to vector<1x4x256xf32>
    %19 = arith.mulf %12, %18 : vector<1x4x256xf32>
    %20 = arith.mulf %7, %19 : vector<1x4x256xf32>
    %21 = arith.addf %17, %20 : vector<1x4x256xf32>
    %c0_16 = arith.constant 0 : index
    %c0_17 = arith.constant 0 : index
    %c0_18 = arith.constant 0 : index
    %22 = vector.load %arg5[%c0_16, %c0_17, %c0_18] : memref<1x4x256xf32, #tpu.memory_space<vmem>>, vector<1x4x256xf32>
    tpu.vector_store %arg5[%c0_16, %c0_17, %c0_18], %21 {strides = array<i32>} : memref<1x4x256xf32, #tpu.memory_space<vmem>>, vector<1x4x256xf32>,
    return
  }
  func.func @transform_0(%arg0: i32, %arg1: i32) -> (i32, i32, i32) {
    %c0_i32 = arith.constant 0 : i32
    %c0_i32_0 = arith.constant 0 : i32
    return %arg0, %c0_i32, %arg1 : i32, i32, i32
  }
  func.func @transform_1(%arg0: i32, %arg1: i32) -> (i32, i32, i32) {
    %c0_i32 = arith.constant 0 : i32
    %c0_i32_0 = arith.constant 0 : i32
    return %arg0, %c0_i32, %arg1 : i32, i32, i32
  }
  func.func @transform_2(%arg0: i32, %arg1: i32) -> (i32, i32, i32) {
    %c0_i32 = arith.constant 0 : i32
    %c0_i32_0 = arith.constant 0 : i32
    return %arg0, %c0_i32, %arg1 : i32, i32, i32
  }
  func.func @transform_3(%arg0: i32, %arg1: i32) -> (i32, i32, i32) {
    %c0_i32 = arith.constant 0 : i32
    %c0_i32_0 = arith.constant 0 : i32
    %c0_i32_1 = arith.constant 0 : i32
    return %arg0, %c0_i32, %c0_i32_0 : i32, i32, i32
  }
}

</mosaic_0001>

<bundles_post_ra>
// kernel: tpu_custom_call.1
= control target key start
LH: loop header
LB: loop body
LE: loop exit
PB: predicated region body
PF: predicated region fallthrough
CT: control target
= control target key end

     0   :  { %8 = vsyncpa [#allocation3], 0  ;;  %s941_s0 = inlined_call_operand.hbm [shape: f32[2,4,256], index: 0, kind: input, shape index: {}]   ;;  %s942_s1 = inlined_call_operand.hbm [shape: f32[2,4,256], index: 1, kind: input, shape index: {}]   ;;  %s943_s2 = inlined_call_operand.vmem [shape: f32[2,1,256], index: 2, kind: input, shape index: {}]   ;;  %s944_s3 = inlined_call_operand.hbm [shape: f32[2,4,256], index: 3, kind: output, shape index: {}]  }
   0x1   :  { %10 = vsyncpa [#allocation3 + $0x1], 0 }
   0x2   :  { %11 = vsyncpa [#allocation6], 0 }
   0x3   :  { %13 = vsyncpa [#allocation6 + $0x1], 0 }
   0x4   :  { %14 = vsyncpa [#allocation4], 0 }
   0x5   :  { %16 = vsyncpa [#allocation4 + $0x1], 0  ;;  %s711_s12 = smov 0   ;;  %s713_s13 = smov 0  }
   0x6   :  { %s715_s14 = smov 0   ;;  %s717_s15 = smov 0  }
   0x7   :  { %s719_s16 = smov 0   ;;  %s721_s17 = smov 0  }
   0x8 LB: > { %s447_s18 = sadd.s32 4294967295, %s685_s17   ;;  %s448_s19 = sadd.s32 4294967294, %s685_s17   ;;  %s685_s17 = sphi %s721_s17, %s22_s17   ;;  %s681_s16 = sphi %s719_s16, %s964_s16   ;;  %s677_s15 = sphi %s717_s15, %s963_s15   ;;  %s673_s14 = sphi %s715_s14, %s962_s14   ;;  %s669_s13 = sphi %s713_s13, %s961_s13   ;;  %s665_s12 = sphi %s711_s12, %s960_s12  }
   0x9   : > { %s34_s20 = sadd.s32 1, %s681_s16  ;;  %s43_s21 = sadd.s32 1, %s673_s14 }
   0xa   : > { %p36_p0 = scmp.ge.s32.totalorder %s34_s20, 2  ;;  %p50_p1 = scmp.ne.s32.totalorder %s673_s14, %s669_s13 }
   0xb   : > { %p51_p2 = scmp.eq.s32.totalorder %s685_s17, 0  ;;  %p56_p3 = scmp.ne.s32.totalorder %s669_s13, %s665_s12 }
   0xc   : > { %s966_s20 = smov (%p36_p0, %s34_s20), 0  ;;  %p57_p5 = scmp.eq.s32.totalorder %s447_s18, 0 }
   0xd   : > { %p752_p4 = por %p51_p2, %p50_p1  ;;  %s38_s23 = ssub.s32 %s681_s16, %s966_s20 }
   0xe   : > { %p136_p6 = scmp.eq.s32.totalorder %s447_s18, 1  ;;  %p41_p7 = scmp.eq.s32.totalorder %s38_s23, 0 }
   0xf   : > { %p758_p8 = por %p57_p5, %p56_p3  ;;  %p142_p10 = scmp.eq.s32.totalorder %s448_s19, 1 }
  0x10   : > { %p762_p9 = por %p136_p6, %p50_p1  ;;  %p487_p13 = scmp.lt.s32.totalorder %s685_s17, 2 }
  0x11   : > { %s948_s24 = scalar_select %p758_p8, 1, 0 }
  0x12   : > { %s949_s25 = scalar_select %p762_p9, 1, 0 }
  0x13   : > { %s767_s26 = scalar_select %p41_p7, %s673_s14, %s43_s21  }
  0x14   : > { %p769_p11 = por %p142_p10, %p56_p3  ;;  %s776_s28 = sand.u32 1, %s673_s14  }
  0x15   : > { %s451_s29 = sshll.u32 %s776_s28, 3  ;;  %s467_s30 = sshll.u32 %s681_s16, 7 }
  0x16   : > { %s950_s27 = scalar_select %p769_p11, 1, 0 }
  0x17   : > { %s785_s6 = scalar_lea.hbm %s941_s0, %s467_s30  ;;  %s166_s7 = scalar_lea.vmem [#allocation2], %s451_s29 }
  0x18   : > { %s176_s8 = sshll.u32 %s166_s7, 4  ;;  %p793_p0 = pnand %p487_p13, %p752_p4  ;;  %s789_s8 = int_to_ptr.vmem [resolvable:$true] %s176_s8 }
  0x19   : > { %s163_s10 = scalar_lea.sflag [#allocation3], %s776_s28  ;;  %s539_s11 = scalar_lea.hbm %s785_s6, 128 }
  0x1a   : > { %p540_p3 = scmp.ne.s32.totalorder %s785_s6, %s539_s11  ;;  %p541_p5 = pneg %p793_p0 }
  0x1b   : > { %s544_s21 = scalar_lea.hbm %s941_s0, 256  ;;  %p545_p4 = scmp.lt.u32.totalorder %s785_s6, %s941_s0 }
  0x1c   : > { %p542_p6 = pnand %p541_p5, %p540_p3  ;;  %p546_p10 = scmp.lt.u32.totalorder %s544_s21, %s539_s11 }
  0x1d   : > { %p548_p12 = scmp.lt.u32.totalorder %s539_s11, %s785_s6 }
  0x1e   : > { %p543_p7 = pneg %p542_p6  ;;  %p547_p13 = por %p546_p10, %p545_p4 }
  0x20   : > { %p549_p1 = por %p548_p12, %p547_p13 }
  0x22   : > { %p550_p2 = pnand %p549_p1, %p543_p7 }
  0x24   : > { %553 = shalt.err (!%p550_p2)
}
  0x25   : > { %s554_s4 = scalar_lea.vmem %s789_s8, 128  ;;  %s687_s5 = smov [#allocation2]  }
  0x26   : > { %p555_p3 = scmp.ne.s32.totalorder %s789_s8, %s554_s4  ;;  %s559_s7 = sshll.u32 %s687_s5, 4  ;;  %s560_s7 = int_to_ptr.vmem [resolvable:$false] %s559_s7 }
  0x27   : > { %s561_s18 = scalar_lea.vmem %s560_s7, 256  ;;  %p562_p9 = scmp.lt.s32.totalorder %s789_s8, %s560_s7 }
  0x28   : > { %p557_p6 = pnand %p555_p3, %p541_p5  ;;  %p563_p4 = scmp.lt.s32.totalorder %s561_s18, %s554_s4 }
  0x2a   : > { %p558_p11 = pneg %p557_p6  ;;  %p564_p10 = por %p563_p4, %p562_p9 }
  0x2c   : > { %p565_p12 = pnand %p564_p10, %p558_p11 }
  0x2e   : > { %568 = shalt.err (!%p565_p12)
}
  0x2f   : > { %479 = dma.hbm_to_vmem [thread:$0]  (!%p793_p0), %s785_s6, 128, %s789_s8, %s163_s10  }
  0x30   : > { %p952_p1 = scmp.lt.s32.totalorder %s685_s17, 3  ;;  %p953_p2 = scmp.ge.s32.totalorder %s685_s17, 1 }
  0x31   : > { %s838_s22 = scalar_lea.hbm %s942_s1, %s467_s30  ;;  %s187_s23 = scalar_lea.vmem [#allocation5], %s451_s29 }
  0x32   : > { %p829_p7 = pnand %p953_p2, %p952_p1  ;;  %s197_s4 = sshll.u32 %s187_s23, 4  ;;  %s198_s4 = int_to_ptr.vmem [resolvable:$true] %s197_s4 }
  0x33   : > { %s184_s6 = scalar_lea.sflag [#allocation6], %s776_s28  ;;  %s569_s8 = scalar_lea.hbm %s838_s22, 128 }
  0x34   : > { %s954_s11 = scalar_select %p829_p7, 1, 0 }
  0x35   : > { %p570_p9 = scmp.ne.s32.totalorder %s838_s22, %s569_s8  ;;  %s574_s30 = scalar_lea.hbm %s942_s1, 256 }
  0x36   : > { %p575_p3 = scmp.lt.u32.totalorder %s838_s22, %s942_s1  ;;  %p576_p6 = scmp.lt.u32.totalorder %s574_s30, %s569_s8 }
  0x37   : > { %p572_p11 = pnand %p570_p9, %p541_p5  ;;  %p578_p10 = scmp.lt.u32.totalorder %s569_s8, %s838_s22 }
  0x38   : > { %p577_p4 = por %p576_p6, %p575_p3 }
  0x39   : > { %p573_p13 = pneg %p572_p11 }
  0x3a   : > { %p579_p12 = por %p578_p10, %p577_p4 }
  0x3c   : > { %p580_p1 = pnand %p579_p12, %p573_p13 }
  0x3e   : > { %583 = shalt.err (!%p580_p1)
}
  0x3f   : > { %s584_s28 = scalar_lea.vmem %s198_s4, 128  ;;  %s688_s29 = smov [#allocation5]  }
  0x40   : > { %p585_p2 = scmp.ne.s32.totalorder %s198_s4, %s584_s28  ;;  %s589_s19 = sshll.u32 %s688_s29, 4  ;;  %s590_s19 = int_to_ptr.vmem [resolvable:$false] %s589_s19 }
  0x41   : > { %s591_s21 = scalar_lea.vmem %s590_s19, 256  ;;  %p592_p8 = scmp.lt.s32.totalorder %s198_s4, %s590_s19 }
  0x42   : > { %p587_p9 = pnand %p585_p2, %p541_p5  ;;  %p593_p7 = scmp.lt.s32.totalorder %s591_s21, %s584_s28 }
  0x44   : > { %p588_p11 = pneg %p587_p9  ;;  %p594_p3 = por %p593_p7, %p592_p8 }
  0x46   : > { %p595_p6 = pnand %p594_p3, %p588_p11 }
  0x48   : > { %598 = shalt.err (!%p595_p6)
}
  0x49   : > { %482 = dma.hbm_to_vmem [thread:$0]  (!%p793_p0), %s838_s22, 128, %s198_s4, %s184_s6  }
  0x4a   : > { %p955_p13 = scmp.ne.s32.totalorder %s954_s11, 0 }
  0x4b   : > { %s865_s23 = sand.u32 (!%p955_p13), 1, %s669_s13   ;;  %p956_p8 = scmp.ne.s32.totalorder (!%p955_p13), %s948_s24, 0 }
  0x4c   : > { %218 = sbr.rel (%p955_p13) target bundleno = 119 (0x77), region = 32  ;;  %s868_s8 = sshll.u32 (!%p955_p13), %s865_s23, 3 }
  0x4d   : > { %s221_s10 = scalar_lea.sflag (!%p955_p13), [#allocation3], %s865_s23  ;;  %s224_s5 = scalar_lea.vmem (!%p955_p13), [#allocation2], %s868_s8 }
  0x53   : > { %652 = dma.done.wait (%p956_p8), %s221_s10, 128  }
  0x54   : > { %654 = vsyncadd (%p956_p8), %s221_s10, 4294967168  ;;  %s230_s9 = scalar_lea.sflag [#allocation6], %s865_s23  ;;  %s233_s11 = scalar_lea.vmem [#allocation5], %s868_s8 }
  0x55   : > { %656 = dma.done.wait (%p956_p8), %s230_s9, 128  }
  0x56   : > { %658 = vsyncadd (%p956_p8), %s230_s9, 4294967168  ;;  %p272_p0 = scmp.lt.s32.totalorder %s677_s15, 1  ;;  %v296_v0 = vlaneseq  ;;  %v285_v2 = vld [vmem:[%s224_s5] sm:$0xff]  ;;  %v286_v3 = vld [vmem:[%s233_s11] sm:$0xff]  ;;  %v689_v12 = vmov 1.0   ;;  %s469_s24 = sshll.u32 %s677_s15, 7 }
  0x57   : > { %v288_v8 = vsub.f32 %v285_v2, %v286_v3  ;;  %vm290_vm0 = vcmp.gt.f32.partialorder %v286_v3, 0.6  ;;  %s268_s18 = scalar_lea.vmem [#allocation7], %s868_s8  ;;  %s892_s21 = scalar_lea.hbm %s944_s3, %s469_s24 }
  0x58   : > { %s273_s22 = scalar_select %p272_p0, %s677_s15, 1  ;;  %v297_v1 = vshrl.u32 %v296_v0, 7  ;;  %v291_v13 = vsel %vm290_vm0, 4.0, %v689_v12 }
  0x59   : > { %v289_v14 = vmul.f32 %v288_v8, %v288_v8  ;;  %s325_s28 = sshll.u32 %s268_s18, 4  ;;  %s311_s10 = scalar_lea.sflag [#allocation4], %s865_s23  ;;  %s894_s28 = int_to_ptr.vmem [resolvable:$true] %s325_s28 }
  0x5a   : > { %s461_s4 = sshll.u32 %s273_s22, 1  ;;  %v298_v6 = vsub.s32 0, %v297_v1  ;;  %v302_v7 = vsub.s32 1, %v297_v1  ;;  %s599_s5 = scalar_lea.vmem %s894_s28, 128 }
  0x5b   : > { %s278_s7 = scalar_lea.vmem %s943_s2, %s461_s4  ;;  %p600_p5 = scmp.ne.s32.totalorder %s894_s28, %s599_s5 }
  0x5c   : > { %v287_v4 = vld [vmem:[%s278_s7] sm:$0x3]  ;;  %p957_p7 = scmp.ne.s32.totalorder %s949_s25, 0  ;;  %s690_s15 = smov [#allocation7]  }
  0x5d   : > { %v292_v5 = vmul.f32 2.0, %v287_v4  ;;  %s603_s8 = sshll.u32 %s690_s15, 4  ;;  %s604_s8 = int_to_ptr.vmem [resolvable:$false] %s603_s8 }
  0x5e   : > { %p601_p4 = pnand %p600_p5, %p957_p7  ;;  %s605_s9 = scalar_lea.vmem %s604_s8, 256 }
  0x5f   : > { %v293_v9 = vadd.f32 1.0, %v292_v5  ;;  %p606_p12 = scmp.lt.s32.totalorder %s894_s28, %s604_s8  ;;  %p607_p1 = scmp.lt.s32.totalorder %s605_s9, %s599_s5 }
  0x60   : > { %p602_p10 = pneg %p601_p4 }
  0x61   : > { %v299_v10 = vrot.slane %v293_v9, %v298_v6  ;;  %v303_v11 = vrot.slane %v293_v9, %v302_v7  ;;  %p608_p2 = por %p607_p1, %p606_p12 }
  0x63   : > { %v304_v15 = vcombine.low %v299_v10, %v303_v11  ;;  %p609_p9 = pnand %p608_p2, %p602_p10 }
  0x65   : > { %v306_v16 = vmul.f32 %v304_v15, %v291_v13 }
  0x67   : > { %v307_v17 = vmul.f32 %v306_v16, %v289_v14 }
  0x69   : > { %309 = vst [vmem:[%s268_s18] sm:$0xff] %v307_v17 }
  0x6a   : > { %612 = shalt.err (!%p609_p9)
}
  0x6b   : > { %s613_s23 = scalar_lea.hbm %s892_s21, 128  ;;  %s617_s4 = scalar_lea.hbm %s944_s3, 256 }
  0x6c   : > { %p614_p11 = scmp.ne.s32.totalorder %s892_s21, %s613_s23  ;;  %p618_p13 = scmp.lt.u32.totalorder %s892_s21, %s944_s3 }
  0x6d   : > { %p619_p8 = scmp.lt.u32.totalorder %s617_s4, %s613_s23  ;;  %p621_p5 = scmp.lt.u32.totalorder %s613_s23, %s892_s21 }
  0x6e   : > { %p615_p3 = pnand %p614_p11, %p957_p7 }
  0x6f   : > { %p620_p0 = por %p619_p8, %p618_p13 }
  0x70   : > { %p616_p6 = pneg %p615_p3 }
  0x71   : > { %p622_p4 = por %p621_p5, %p620_p0 }
  0x73   : > { %p623_p10 = pnand %p622_p4, %p616_p6 }
  0x75   : > { %626 = shalt.err (!%p623_p10)
}
  0x76   : > { %474 = dma.vmem_to_hbm [thread:$0]  (%p957_p7), %s894_s28, 128, %s892_s21, %s311_s10  }
  0x77 PF: > { %s337_s7 = sand.u32 1, %s665_s12   ;;  %p958_p12 = scmp.ne.s32.totalorder %s950_s27, 0 }
  0x78   : > { %p959_p1 = scmp.ge.s32.totalorder %s685_s17, 2  ;;  %s338_s24 = scalar_lea.sflag [#allocation4], %s337_s7 }
  0x7a   : > { %p484_p2 = pnand %p959_p1, %p958_p12 }
  0x7c   : > { %660 = dma.done.wait (!%p484_p2), %s338_s24, 128  }
  0x7d   : > { %662 = vsyncadd (!%p484_p2), %s338_s24, 4294967168  ;;  %s22_s17 = sadd.s32 1, %s685_s17   ;;  %s960_s12 = smov %s669_s13 }
  0x7e   : > { %p19_p9 = scmp.ge.s32.totalorder %s22_s17, 4   ;;  %s961_s13 = smov %s673_s14 }
  0x7f   : > { %s962_s14 = smov %s767_s26  ;;  %s963_s15 = smov %s681_s16 }
  0x80   : > { %s964_s16 = smov %s966_s20  ;;  %21 = sbr.rel (!%p19_p9) target bundleno = 8 (0x8), region = 97 }
  0x87   :  { %343 = vsyncpa [#allocation3], 1 }
  0x88   :  { %345 = vsyncpa [#allocation3 + $0x1], 1 }
  0x89   :  { %346 = vsyncpa [#allocation6], 1 }
  0x8a   :  { %348 = vsyncpa [#allocation6 + $0x1], 1 }
  0x8b   :  { %349 = vsyncpa [#allocation4], 1 }
  0x8c   :  { %351 = vsyncpa [#allocation4 + $0x1], 1 }

</bundles_post_ra>
